<compile_context>
chip_gen: v7x
topology: tpu7x:2x2x1
jax: 0.10.0
libtpu: 0.0.40
codegen_flags: <defaults>
</compile_context>

<pallas_src>
import functools

import jax
import jax.numpy as jnp
from jax.experimental import pallas as pl
from jax.experimental.pallas import tpu as pltpu


# ----------------------------------------------------------------------------
# Helpers
# ----------------------------------------------------------------------------
def _round_up(x, m):
    return ((x + m - 1) // m) * m


def _pick_tile(dim, target, align):
    """Return (tile, padded_dim): tile is a multiple of `align`, padded_dim of tile."""
    if dim <= target:
        t = _round_up(dim, align)
    else:
        t = target
    return t, _round_up(dim, t)


# ----------------------------------------------------------------------------
# Pallas kernels
# ----------------------------------------------------------------------------
def _matmul_bn_kernel(x_ref, w_ref, scale_ref, shift_ref, o_ref, acc_ref, *, relu):
    """Tiled matmul with fused BN(eval) [+ ReLU] epilogue. K is grid axis 2."""
    k = pl.program_id(2)

    @pl.when(k == 0)
    def _():
        acc_ref[...] = jnp.zeros_like(acc_ref)

    acc_ref[...] += jnp.dot(x_ref[...], w_ref[...],
                            preferred_element_type=jnp.float32)

    @pl.when(k == pl.num_programs(2) - 1)
    def _():
        y = acc_ref[...] * scale_ref[...] + shift_ref[...]
        if relu:
            y = jnp.maximum(y, 0.0)
        o_ref[...] = y


def _matmul_bn_res_kernel(x_ref, w_ref, scale_ref, shift_ref, res_ref, o_ref, acc_ref):
    """Same as above but with the residual add + ReLU fused into the epilogue."""
    k = pl.program_id(2)

    @pl.when(k == 0)
    def _():
        acc_ref[...] = jnp.zeros_like(acc_ref)

    acc_ref[...] += jnp.dot(x_ref[...], w_ref[...],
                            preferred_element_type=jnp.float32)

    @pl.when(k == pl.num_programs(2) - 1)
    def _():
        y = acc_ref[...] * scale_ref[...] + shift_ref[...] + res_ref[...]
        o_ref[...] = jnp.maximum(y, 0.0)


def _maxpool_kernel(*refs):
    # refs = 9 tap inputs (tm, C) + output (tm, C)
    o_ref = refs[-1]
    result = refs[0][...]
    for r in refs[1:9]:
        result = jnp.maximum(result, r[...])
    o_ref[...] = result


def _gap_kernel(x_ref, o_ref):
    # x: (1, H*W, C) -> (1, 1, C) mean over spatial
    o_ref[...] = jnp.mean(x_ref[...], axis=1, keepdims=True)


# ----------------------------------------------------------------------------
# Tiled conv matmul wrapper (bf16 MXU, f32 accumulate, fused BN/ReLU/residual)
# ----------------------------------------------------------------------------
def _tiled_conv_matmul(x2d, w2d, scale, shift, residual, relu):
    m, k = x2d.shape
    _, n = w2d.shape
    tm, m_pad = _pick_tile(m, 512, 8)
    tn, n_pad = _pick_tile(n, 256, 128)
    tk, k_pad = _pick_tile(k, 256, 128)

    x2d = jnp.pad(x2d, ((0, m_pad - m), (0, k_pad - k))).astype(jnp.bfloat16)
    w2d = jnp.pad(w2d, ((0, k_pad - k), (0, n_pad - n))).astype(jnp.bfloat16)
    scale = jnp.pad(scale.reshape(1, n).astype(jnp.float32),
                    ((0, 0), (0, n_pad - n)))
    shift = jnp.pad(shift.reshape(1, n).astype(jnp.float32),
                    ((0, 0), (0, n_pad - n)))

    grid = (m_pad // tm, n_pad // tn, k_pad // tk)
    x_spec = pl.BlockSpec((tm, tk), lambda i, j, kk: (i, kk))
    w_spec = pl.BlockSpec((tk, tn), lambda i, j, kk: (kk, j))
    s_spec = pl.BlockSpec((1, tn), lambda i, j, kk: (0, j))
    o_spec = pl.BlockSpec((tm, tn), lambda i, j, kk: (i, j))

    bytes_accessed = (m_pad * k_pad + k_pad * n_pad) * 2 + m_pad * n_pad * 4
    inputs = [x2d, w2d, scale, shift]
    in_specs = [x_spec, w_spec, s_spec, s_spec]
    if residual is not None:
        res = jnp.pad(residual.astype(jnp.float32),
                      ((0, m_pad - m), (0, n_pad - n)))
        inputs.append(res)
        in_specs.append(o_spec)
        bytes_accessed += m_pad * n_pad * 4
        kernel = _matmul_bn_res_kernel
    else:
        kernel = functools.partial(_matmul_bn_kernel, relu=relu)

    out = pl.pallas_call(
        kernel,
        out_shape=jax.ShapeDtypeStruct((m_pad, n_pad), jnp.float32),
        grid_spec=pltpu.PrefetchScalarGridSpec(
            num_scalar_prefetch=0,
            grid=grid,
            in_specs=in_specs,
            out_specs=o_spec,
            scratch_shapes=[pltpu.VMEM((tm, tn), jnp.float32)],
        ),
        compiler_params=pltpu.CompilerParams(
            dimension_semantics=("parallel", "parallel", "arbitrary")),
        cost_estimate=pl.CostEstimate(
            flops=2 * m_pad * n_pad * k_pad,
            transcendentals=0,
            bytes_accessed=bytes_accessed),
    )(*inputs)
    return out[:m, :n]


# ----------------------------------------------------------------------------
# Conv / pool wrappers (plain-JAX glue + Pallas compute)
# ----------------------------------------------------------------------------
def _im2col(x, kh, kw, stride, pad, pad_value=0.0):
    """x: (N, H, W, C) -> patches (N, Ho, Wo, kh*kw, C)."""
    n, h, w, c = x.shape
    xp = jnp.pad(x, ((0, 0), (pad, pad), (pad, pad), (0, 0)),
                 constant_values=pad_value)
    ho = (h + 2 * pad - kh) // stride + 1
    wo = (w + 2 * pad - kw) // stride + 1
    taps = []
    for i in range(kh):
        for j in range(kw):
            taps.append(xp[:, i:i + stride * ho:stride, j:j + stride * wo:stride, :])
    patches = jnp.stack(taps, axis=3)
    return patches, ho, wo


@functools.partial(jax.jit, static_argnames=("stride", "relu"))
def conv_bn(x, w, scale, shift, residual=None, *, stride, relu):
    """Conv2d (no bias) + BatchNorm(eval) [+ residual] [+ ReLU].

    x: (N,H,W,Cin) f32, w: (kh,kw,Cin,Cout). Returns (N,Ho,Wo,Cout) f32.
    """
    kh, kw, cin, cout = w.shape
    n = x.shape[0]
    x = x.astype(jnp.bfloat16)
    if kh == 1 and kw == 1:
        if stride > 1:
            x = x[:, ::stride, ::stride, :]
        ho, wo = x.shape[1], x.shape[2]
        x2d = x.reshape(n * ho * wo, cin)
    else:
        # TODO(synk): 3x3/7x7 convs still materialize im2col patches in HBM; a
        # tap-accumulation BlockSpec over shifted activation views would cut that
        # activation traffic ~kh*kw x.
        pad = (kh - 1) // 2
        patches, ho, wo = _im2col(x, kh, kw, stride, pad)
        x2d = patches.reshape(n * ho * wo, kh * kw * cin)
    w2d = w.reshape(kh * kw * cin, cout)
    res2d = None if residual is None else residual.reshape(n * ho * wo, cout)
    y2d = _tiled_conv_matmul(x2d, w2d, scale, shift, res2d, relu)
    return y2d.reshape(n, ho, wo, cout)


@jax.jit
def maxpool_3x3_s2(x):
    """3x3 stride-2 pad-1 max pool, NHWC."""
    n, h, w, c = x.shape
    ho = (h + 2 - 3) // 2 + 1
    wo = (w + 2 - 3) // 2 + 1
    xp = jnp.pad(x, ((0, 0), (1, 1), (1, 1), (0, 0)), constant_values=-jnp.inf)
    m = n * ho * wo
    tm, m_pad = _pick_tile(m, 512, 8)
    taps = []
    for i in range(3):
        for j in range(3):
            t = xp[:, i:i + 2 * ho:2, j:j + 2 * wo:2, :].reshape(m, c)
            taps.append(jnp.pad(t, ((0, m_pad - m), (0, 0)),
                                constant_values=-jnp.inf))
    spec = pl.BlockSpec((tm, c), lambda i: (i, 0))
    out = pl.pallas_call(
        _maxpool_kernel,
        out_shape=jax.ShapeDtypeStruct((m_pad, c), jnp.float32),
        grid_spec=pltpu.PrefetchScalarGridSpec(
            num_scalar_prefetch=0,
            grid=(m_pad // tm,),
            in_specs=[spec] * 9,
            out_specs=spec),
        compiler_params=pltpu.CompilerParams(dimension_semantics=("parallel",)),
    )(*taps)
    return out[:m].reshape(n, ho, wo, c)


@jax.jit
def global_avg_pool(x):
    """Adaptive avg pool to 1x1: (N,H,W,C) -> (N,C)."""
    n, h, w, c = x.shape
    x3 = x.reshape(n, h * w, c)
    out = pl.pallas_call(
        _gap_kernel,
        out_shape=jax.ShapeDtypeStruct((n, 1, c), jnp.float32),
        grid_spec=pltpu.PrefetchScalarGridSpec(
            num_scalar_prefetch=0,
            grid=(n,),
            in_specs=[pl.BlockSpec((1, h * w, c), lambda i: (i, 0, 0))],
            out_specs=pl.BlockSpec((1, 1, c), lambda i: (i, 0, 0))),
        compiler_params=pltpu.CompilerParams(dimension_semantics=("parallel",)),
    )(x3)
    return out.reshape(n, c)


# ----------------------------------------------------------------------------
# Deterministic parameter init (ResNet50 shapes; synthetic, not a checkpoint)
# ----------------------------------------------------------------------------
def _init_conv_bn(key, kh, kw, cin, cout):
    kw_, kg, kb, km, kv = jax.random.split(key, 5)
    fan_in = kh * kw * cin
    w = jax.random.normal(kw_, (kh, kw, cin, cout), jnp.float32) * jnp.sqrt(2.0 / fan_in)
    gamma = jax.random.uniform(kg, (cout,), jnp.float32, 0.9, 1.1)
    beta = jax.random.normal(kb, (cout,), jnp.float32) * 0.05
    mean = jax.random.normal(km, (cout,), jnp.float32) * 0.05
    var = jax.random.uniform(kv, (cout,), jnp.float32, 0.8, 1.2)
    scale = gamma / jnp.sqrt(var + 1e-5)
    shift = beta - mean * scale
    return {"w": w, "scale": scale, "shift": shift}


def init_resnet50_params(key):
    # TODO(synk): pretrained torchvision weights cannot be loaded here; parameters are
    # deterministic synthetic inits with the exact ResNet50 shapes.
    keys = iter(jax.random.split(key, 128))
    params = {"stem": _init_conv_bn(next(keys), 7, 7, 3, 64)}
    layers_cfg = [(64, 3, 1), (128, 4, 2), (256, 6, 2), (512, 3, 2)]
    in_c = 64
    layers = []
    for planes, nblocks, stride in layers_cfg:
        blocks = []
        for b in range(nblocks):
            s = stride if b == 0 else 1
            blk = {
                "conv1": _init_conv_bn(next(keys), 1, 1, in_c, planes),
                "conv2": _init_conv_bn(next(keys), 3, 3, planes, planes),
                "conv3": _init_conv_bn(next(keys), 1, 1, planes, planes * 4),
                "stride": s,
            }
            if s != 1 or in_c != planes * 4:
                blk["downsample"] = _init_conv_bn(next(keys), 1, 1, in_c, planes * 4)
            blocks.append(blk)
            in_c = planes * 4
        layers.append(blocks)
    params["layers"] = layers
    return params


# ----------------------------------------------------------------------------
# Forward pass (ResNet50 backbone, eval mode, pure inference)
# ----------------------------------------------------------------------------
def _bottleneck(x, blk):
    if "downsample" in blk:
        ds = blk["downsample"]
        identity = conv_bn(x, ds["w"], ds["scale"], ds["shift"],
                           stride=blk["stride"], relu=False)
    else:
        identity = x
    out = conv_bn(x, blk["conv1"]["w"], blk["conv1"]["scale"], blk["conv1"]["shift"],
                  stride=1, relu=True)
    out = conv_bn(out, blk["conv2"]["w"], blk["conv2"]["scale"], blk["conv2"]["shift"],
                  stride=blk["stride"], relu=True)
    # residual add + ReLU fused into the conv3 matmul epilogue
    out = conv_bn(out, blk["conv3"]["w"], blk["conv3"]["scale"], blk["conv3"]["shift"],
                  identity, stride=1, relu=True)
    return out


def encoder_cnn_forward(images_nchw, params):
    """images_nchw: (N, 3, H, W) float32 -> features (N, 2048, 1, 1)."""
    x = jnp.transpose(images_nchw, (0, 2, 3, 1)).astype(jnp.float32)  # NCHW -> NHWC
    stem = params["stem"]
    x = conv_bn(x, stem["w"], stem["scale"], stem["shift"], stride=2, relu=True)
    x = maxpool_3x3_s2(x)
    for blocks in params["layers"]:
        for blk in blocks:
            x = _bottleneck(x, blk)
    feats = global_avg_pool(x)                        # (N, 2048)
    return feats[:, :, None, None]                    # (N, 2048, 1, 1), PyTorch layout


if __name__ == "__main__":
    key = jax.random.PRNGKey(0)
    pkey, xkey = jax.random.split(key)
    params = init_resnet50_params(pkey)
    images = jax.random.normal(xkey, (2, 3, 32, 32), jnp.float32)  # small NCHW batch
    feats = encoder_cnn_forward(images, params)
    feats = jax.block_until_ready(feats)
    assert feats.shape == (2, 2048, 1, 1), feats.shape
    assert bool(jnp.all(jnp.isfinite(feats)))
    print("KERNEL_OK")
</pallas_src>

<mosaic_0001>
module attributes {stable_mosaic.version = 11 : i64} {
  func.func @_matmul_bn_kernel(%arg0: i32, %arg1: i32, %arg2: i32, %arg3: memref<512x256xbf16, #tpu.memory_space<vmem>>, %arg4: memref<256x128xbf16, #tpu.memory_space<vmem>>, %arg5: memref<1x128xf32, #tpu.memory_space<vmem>>, %arg6: memref<1x128xf32, #tpu.memory_space<vmem>>, %arg7: memref<512x128xf32, #tpu.memory_space<vmem>>, %arg8: memref<512x128xf32, #tpu.memory_space<vmem>>) attributes {dimension_semantics = [#tpu.dimension_semantics<parallel>, #tpu.dimension_semantics<parallel>, #tpu.dimension_semantics<arbitrary>], iteration_bounds = array<i64: 1, 1, 1>, scalar_prefetch = 0 : i64, scratch_operands = 1 : i64, tpu.core_type = #tpu.core_type<tc>, window_params = [{transform_indices = @transform_0, window_bounds = array<i64: 512, 256>}, {transform_indices = @transform_1, window_bounds = array<i64: 256, 128>}, {transform_indices = @transform_2, window_bounds = array<i64: 1, 128>}, {transform_indices = @transform_3, window_bounds = array<i64: 1, 128>}, {transform_indices = @transform_4, window_bounds = array<i64: 512, 128>}]} {
    %c0_i32 = arith.constant 0 : i32
    %0 = arith.cmpi eq, %arg2, %c0_i32 : i32
    %1 = arith.extui %0 : i1 to i32
    %c0_i32_0 = arith.constant 0 : i32
    %2 = arith.cmpi ne, %1, %c0_i32_0 : i32
    scf.if %2 {
      %cst_10 = arith.constant 0.000000e+00 : f32
      %12 = vector.broadcast %cst_10 : f32 to vector<512x128xf32>
      %c0_11 = arith.constant 0 : index
      %c0_12 = arith.constant 0 : index
      %13 = vector.load %arg8[%c0_11, %c0_12] : memref<512x128xf32, #tpu.memory_space<vmem>>, vector<512x128xf32>
      tpu.vector_store %arg8[%c0_11, %c0_12], %12 {strides = array<i32>} : memref<512x128xf32, #tpu.memory_space<vmem>>, vector<512x128xf32>,
    } else {
    }
    %c0 = arith.constant 0 : index
    %c0_1 = arith.constant 0 : index
    %3 = vector.load %arg8[%c0, %c0_1] : memref<512x128xf32, #tpu.memory_space<vmem>>, vector<512x128xf32>
    %c0_2 = arith.constant 0 : index
    %c0_3 = arith.constant 0 : index
    %4 = vector.load %arg3[%c0_2, %c0_3] : memref<512x256xbf16, #tpu.memory_space<vmem>>, vector<512x256xbf16>
    %c0_4 = arith.constant 0 : index
    %c0_5 = arith.constant 0 : index
    %5 = vector.load %arg4[%c0_4, %c0_5] : memref<256x128xbf16, #tpu.memory_space<vmem>>, vector<256x128xbf16>
    %cst = arith.constant dense<0.000000e+00> : vector<512x128xf32>
    %6 = tpu.matmul %4, %5, %cst {dimension_numbers = #tpu.dot_dimension_numbers<[1], [0], [0], [1], [0, 0, 1, 1], [], []>} : vector<512x256xbf16>, vector<256x128xbf16>, vector<512x128xf32> -> vector<512x128xf32>
    %7 = arith.addf %3, %6 : vector<512x128xf32>
    %c0_6 = arith.constant 0 : index
    %c0_7 = arith.constant 0 : index
    %8 = vector.load %arg8[%c0_6, %c0_7] : memref<512x128xf32, #tpu.memory_space<vmem>>, vector<512x128xf32>
    tpu.vector_store %arg8[%c0_6, %c0_7], %7 {strides = array<i32>} : memref<512x128xf32, #tpu.memory_space<vmem>>, vector<512x128xf32>,
    %c0_i32_8 = arith.constant 0 : i32
    %9 = arith.cmpi eq, %arg2, %c0_i32_8 : i32
    %10 = arith.extui %9 : i1 to i32
    %c0_i32_9 = arith.constant 0 : i32
    %11 = arith.cmpi ne, %10, %c0_i32_9 : i32
    scf.if %11 {
      %c0_10 = arith.constant 0 : index
      %c0_11 = arith.constant 0 : index
      %12 = vector.load %arg8[%c0_10, %c0_11] : memref<512x128xf32, #tpu.memory_space<vmem>>, vector<512x128xf32>
      %c0_12 = arith.constant 0 : index
      %c0_13 = arith.constant 0 : index
      %13 = vector.load %arg5[%c0_12, %c0_13] : memref<1x128xf32, #tpu.memory_space<vmem>>, vector<1x128xf32>
      %14 = vector.broadcast %13 : vector<1x128xf32> to vector<512x128xf32>
      %15 = arith.mulf %12, %14 : vector<512x128xf32>
      %c0_14 = arith.constant 0 : index
      %c0_15 = arith.constant 0 : index
      %16 = vector.load %arg6[%c0_14, %c0_15] : memref<1x128xf32, #tpu.memory_space<vmem>>, vector<1x128xf32>
      %17 = vector.broadcast %16 : vector<1x128xf32> to vector<512x128xf32>
      %18 = arith.addf %15, %17 : vector<512x128xf32>
      %cst_16 = arith.constant 0.000000e+00 : f32
      %19 = vector.broadcast %cst_16 : f32 to vector<512x128xf32>
      %20 = arith.maximumf %18, %19 : vector<512x128xf32>
      %c0_17 = arith.constant 0 : index
      %c0_18 = arith.constant 0 : index
      %21 = vector.load %arg7[%c0_17, %c0_18] : memref<512x128xf32, #tpu.memory_space<vmem>>, vector<512x128xf32>
      tpu.vector_store %arg7[%c0_17, %c0_18], %20 {strides = array<i32>} : memref<512x128xf32, #tpu.memory_space<vmem>>, vector<512x128xf32>,
    } else {
    }
    return
  }
  func.func @transform_0(%arg0: i32, %arg1: i32, %arg2: i32) -> (i32, i32) {
    %c0_i32 = arith.constant 0 : i32
    return %arg0, %arg2 : i32, i32
  }
  func.func @transform_1(%arg0: i32, %arg1: i32, %arg2: i32) -> (i32, i32) {
    %c0_i32 = arith.constant 0 : i32
    return %arg2, %arg1 : i32, i32
  }
  func.func @transform_2(%arg0: i32, %arg1: i32, %arg2: i32) -> (i32, i32) {
    %c0_i32 = arith.constant 0 : i32
    %c0_i32_0 = arith.constant 0 : i32
    return %c0_i32, %arg1 : i32, i32
  }
  func.func @transform_3(%arg0: i32, %arg1: i32, %arg2: i32) -> (i32, i32) {
    %c0_i32 = arith.constant 0 : i32
    %c0_i32_0 = arith.constant 0 : i32
    return %c0_i32, %arg1 : i32, i32
  }
  func.func @transform_4(%arg0: i32, %arg1: i32, %arg2: i32) -> (i32, i32) {
    %c0_i32 = arith.constant 0 : i32
    return %arg0, %arg1 : i32, i32
  }
}

</mosaic_0001>

<bundles_post_ra>
// kernel: conv_bn.1
= control target key start
LH: loop header
LB: loop body
LE: loop exit
PB: predicated region body
PF: predicated region fallthrough
CT: control target
= control target key end

     0   :  { %v1687_v1 = vmov 0   ;;  %s2138_s0 = inlined_call_operand.vmem [shape: bf16[512,256], index: 0, kind: input, shape index: {}]   ;;  %s2139_s1 = inlined_call_operand.vmem [shape: bf16[256,128], index: 1, kind: input, shape index: {}]   ;;  %s2140_s2 = inlined_call_operand.vmem [shape: f32[1,128], index: 2, kind: input, shape index: {}]   ;;  %s2141_s3 = inlined_call_operand.vmem [shape: f32[1,128], index: 3, kind: input, shape index: {}]   ;;  %s2142_s4 = inlined_call_operand.hbm [shape: f32[512,128], index: 4, kind: output, shape index: {}]  }
   0x1   :  { %v1551_v0 = vld [vmem:[%s2139_s1] sm:$0xff]   ;;  %663 = vmatprep.subr.bf16.mxu0 %v1687_v1  ;;  %1515 = vmatprep.subr.bf16.mxu1 %v1687_v1  ;;  %v1552_v2 = vld [vmem:[%s2139_s1 + $0x8] sm:$0xff]   ;;  %v1553_v3 = vld [vmem:[%s2139_s1 + $0x10] sm:$0xff]  }
   0x2   :  { %664 = vmatpush1.bf16.msra.mxu0 %v1551_v0  ;;  %1531 = vmatpush1.bf16.msra.mxu1 %v1551_v0  ;;  %v1554_v4 = vld [vmem:[%s2139_s1 + $0x18] sm:$0xff]   ;;  %v1555_v5 = vld [vmem:[%s2139_s1 + $0x20] sm:$0xff]   ;;  %v1556_v7 = vld [vmem:[%s2139_s1 + $0x28] sm:$0xff]  }
   0x3   :  { %665 = vmatprep.subr.bf16.mxu0 %v1687_v1  ;;  %1516 = vmatprep.subr.bf16.mxu1 %v1687_v1  ;;  %v1569_v6 = vld [vmem:[%s2138_s0 + $0x4] ss:$8 sps:$4 sm:$0xff]   ;;  %v1557_v9 = vld [vmem:[%s2139_s1 + $0x30] sm:$0xff]   ;;  %v1558_v10 = vld [vmem:[%s2139_s1 + $0x38] sm:$0xff]  }
   0x4   :  { %v1572_v8 = vld [vmem:[%s2138_s0 + $0x104] ss:$8 sps:$4 sm:$0xff]   ;;  %695 = vmatprep.mubr.bf16.mxu0 %v1569_v6  ;;  %v1561_v13 = vld [vmem:[%s2139_s1 + $0x50] sm:$0xff]   ;;  %v1562_v14 = vld [vmem:[%s2139_s1 + $0x58] sm:$0xff]  }
   0x5   :  { %823 = vmatprep.mubr.bf16.mxu1 %v1572_v8  ;;  %v1559_v11 = vld [vmem:[%s2139_s1 + $0x40] sm:$0xff]   ;;  %v1560_v12 = vld [vmem:[%s2139_s1 + $0x48] sm:$0xff]   ;;  %v1565_v17 = vld [vmem:[%s2139_s1 + $0x70] sm:$0xff]  }
   0x6   :  { %666 = vmatpush1.bf16.msra.mxu0 %v1552_v2  ;;  %1532 = vmatpush1.bf16.msra.mxu1 %v1552_v2  ;;  %v1563_v15 = vld [vmem:[%s2139_s1 + $0x60] sm:$0xff]   ;;  %v1564_v16 = vld [vmem:[%s2139_s1 + $0x68] sm:$0xff]   ;;  %v1566_v18 = vld [vmem:[%s2139_s1 + $0x78] sm:$0xff]  }
   0x7   :  { %667 = vmatprep.subr.bf16.mxu0 %v1687_v1  ;;  %1517 = vmatprep.subr.bf16.mxu1 %v1687_v1 }
   0xa   :  { %668 = vmatpush1.bf16.msra.mxu0 %v1553_v3  ;;  %1533 = vmatpush1.bf16.msra.mxu1 %v1553_v3 }
   0xb   :  { %669 = vmatprep.subr.bf16.mxu0 %v1687_v1  ;;  %1518 = vmatprep.subr.bf16.mxu1 %v1687_v1 }
   0xe   :  { %670 = vmatpush1.bf16.msra.mxu0 %v1554_v4  ;;  %1534 = vmatpush1.bf16.msra.mxu1 %v1554_v4 }
   0xf   :  { %671 = vmatprep.subr.bf16.mxu0 %v1687_v1  ;;  %1519 = vmatprep.subr.bf16.mxu1 %v1687_v1 }
  0x12   :  { %672 = vmatpush1.bf16.msra.mxu0 %v1555_v5  ;;  %1535 = vmatpush1.bf16.msra.mxu1 %v1555_v5 }
  0x13   :  { %673 = vmatprep.subr.bf16.mxu0 %v1687_v1  ;;  %1520 = vmatprep.subr.bf16.mxu1 %v1687_v1 }
  0x16   :  { %674 = vmatpush1.bf16.msra.mxu0 %v1556_v7  ;;  %1536 = vmatpush1.bf16.msra.mxu1 %v1556_v7 }
  0x17   :  { %675 = vmatprep.subr.bf16.mxu0 %v1687_v1  ;;  %1521 = vmatprep.subr.bf16.mxu1 %v1687_v1 }
  0x1a   :  { %676 = vmatpush1.bf16.msra.mxu0 %v1557_v9  ;;  %1537 = vmatpush1.bf16.msra.mxu1 %v1557_v9 }
  0x1b   :  { %677 = vmatprep.subr.bf16.mxu0 %v1687_v1  ;;  %1522 = vmatprep.subr.bf16.mxu1 %v1687_v1 }
  0x1e   :  { %678 = vmatpush1.bf16.msra.mxu0 %v1558_v10  ;;  %1538 = vmatpush1.bf16.msra.mxu1 %v1558_v10 }
  0x1f   :  { %679 = vmatprep.subr.bf16.mxu0 %v1687_v1  ;;  %1523 = vmatprep.subr.bf16.mxu1 %v1687_v1 }
  0x22   :  { %680 = vmatpush1.bf16.msra.mxu0 %v1559_v11  ;;  %1539 = vmatpush1.bf16.msra.mxu1 %v1559_v11 }
  0x23   :  { %681 = vmatprep.subr.bf16.mxu0 %v1687_v1  ;;  %1524 = vmatprep.subr.bf16.mxu1 %v1687_v1 }
  0x26   :  { %682 = vmatpush1.bf16.msra.mxu0 %v1560_v12  ;;  %1540 = vmatpush1.bf16.msra.mxu1 %v1560_v12 }
  0x27   :  { %683 = vmatprep.subr.bf16.mxu0 %v1687_v1  ;;  %1525 = vmatprep.subr.bf16.mxu1 %v1687_v1 }
  0x2a   :  { %684 = vmatpush1.bf16.msra.mxu0 %v1561_v13  ;;  %1541 = vmatpush1.bf16.msra.mxu1 %v1561_v13 }
  0x2b   :  { %685 = vmatprep.subr.bf16.mxu0 %v1687_v1  ;;  %1526 = vmatprep.subr.bf16.mxu1 %v1687_v1 }
  0x2e   :  { %686 = vmatpush1.bf16.msra.mxu0 %v1562_v14  ;;  %1542 = vmatpush1.bf16.msra.mxu1 %v1562_v14 }
  0x2f   :  { %687 = vmatprep.subr.bf16.mxu0 %v1687_v1  ;;  %1527 = vmatprep.subr.bf16.mxu1 %v1687_v1 }
  0x32   :  { %688 = vmatpush1.bf16.msra.mxu0 %v1563_v15  ;;  %1543 = vmatpush1.bf16.msra.mxu1 %v1563_v15 }
  0x33   :  { %689 = vmatprep.subr.bf16.mxu0 %v1687_v1  ;;  %1528 = vmatprep.subr.bf16.mxu1 %v1687_v1 }
  0x36   :  { %690 = vmatpush1.bf16.msra.mxu0 %v1564_v16  ;;  %1544 = vmatpush1.bf16.msra.mxu1 %v1564_v16 }
  0x37   :  { %691 = vmatprep.subr.bf16.mxu0 %v1687_v1  ;;  %1529 = vmatprep.subr.bf16.mxu1 %v1687_v1 }
  0x3a   :  { %692 = vmatpush1.bf16.msra.mxu0 %v1565_v17  ;;  %1545 = vmatpush1.bf16.msra.mxu1 %v1565_v17 }
  0x3b   :  { %9 = vsyncpa [#allocation4], 0  ;;  %693 = vmatprep.subr.bf16.mxu0 %v1687_v1  ;;  %1530 = vmatprep.subr.bf16.mxu1 %v1687_v1  ;;  %v1567_v19 = vld [vmem:[%s2138_s0] ss:$8 sps:$4 sm:$0xff]   ;;  %v1573_v21 = vld [vmem:[%s2138_s0 + $0x14] ss:$8 sps:$4 sm:$0xff]  }
  0x3c   :  { %v1570_v20 = vld [vmem:[%s2138_s0 + $0x100] ss:$8 sps:$4 sm:$0xff]   ;;  %v1575_v22 = vld [vmem:[%s2138_s0 + $0x114] ss:$8 sps:$4 sm:$0xff]   ;;  %v1577_v23 = vld [vmem:[%s2138_s0 + $0x10] ss:$8 sps:$4 sm:$0xff]  }
  0x3d   :  { %v1578_v24 = vld [vmem:[%s2138_s0 + $0x110] ss:$8 sps:$4 sm:$0xff]   ;;  %v1579_v25 = vld [vmem:[%s2138_s0 + $0x24] ss:$8 sps:$4 sm:$0xff]   ;;  %v1583_v27 = vld [vmem:[%s2138_s0 + $0x20] ss:$8 sps:$4 sm:$0xff]  }
  0x3e   :  { %694 = vmatpush1.bf16.msra.mxu0 %v1566_v18  ;;  %1546 = vmatpush1.bf16.msra.mxu1 %v1566_v18  ;;  %v1581_v26 = vld [vmem:[%s2138_s0 + $0x124] ss:$8 sps:$4 sm:$0xff]   ;;  %v1584_v28 = vld [vmem:[%s2138_s0 + $0x120] ss:$8 sps:$4 sm:$0xff]   ;;  %v1585_v29 = vld [vmem:[%s2138_s0 + $0x34] ss:$8 sps:$4 sm:$0xff]  }
  0x3f   :  { %v1587_v30 = vld [vmem:[%s2138_s0 + $0x134] ss:$8 sps:$4 sm:$0xff]   ;;  %v1589_v31 = vld [vmem:[%s2138_s0 + $0x30] ss:$8 sps:$4 sm:$0xff]   ;;  %v1591_v33 = vld [vmem:[%s2138_s0 + $0x44] ss:$8 sps:$4 sm:$0xff]  }
  0x40   :  { %v1590_v32 = vld [vmem:[%s2138_s0 + $0x130] ss:$8 sps:$4 sm:$0xff]   ;;  %v1593_v34 = vld [vmem:[%s2138_s0 + $0x144] ss:$8 sps:$4 sm:$0xff]   ;;  %v1595_v35 = vld [vmem:[%s2138_s0 + $0x40] ss:$8 sps:$4 sm:$0xff]  }
  0x41   :  { %696 = vmatmul.mubr.bf16.vlgmr.msra.gmra.mrb[0].mxu0 %v1567_v19  ;;  %824 = vmatmul.mubr.bf16.vlgmr.msra.gmra.mrb[0].mxu1 %v1570_v20  ;;  %v1596_v36 = vld [vmem:[%s2138_s0 + $0x140] ss:$8 sps:$4 sm:$0xff]   ;;  %v1597_v37 = vld [vmem:[%s2138_s0 + $0x54] ss:$8 sps:$4 sm:$0xff]   ;;  %v1601_v39 = vld [vmem:[%s2138_s0 + $0x50] ss:$8 sps:$4 sm:$0xff]  }
  0x42   :  { %703 = vmatprep.mubr.bf16.mxu0 %v1573_v21  ;;  %831 = vmatprep.mubr.bf16.mxu1 %v1575_v22  ;;  %v1599_v38 = vld [vmem:[%s2138_s0 + $0x154] ss:$8 sps:$4 sm:$0xff]   ;;  %v1602_v40 = vld [vmem:[%s2138_s0 + $0x150] ss:$8 sps:$4 sm:$0xff]   ;;  %v1603_v41 = vld [vmem:[%s2138_s0 + $0x64] ss:$8 sps:$4 sm:$0xff]  }
  0x43   :  { %v1605_v42 = vld [vmem:[%s2138_s0 + $0x164] ss:$8 sps:$4 sm:$0xff]   ;;  %v1607_v43 = vld [vmem:[%s2138_s0 + $0x60] ss:$8 sps:$4 sm:$0xff]   ;;  %v1609_v45 = vld [vmem:[%s2138_s0 + $0x74] ss:$8 sps:$4 sm:$0xff]  }
  0x44   :  { %v1608_v44 = vld [vmem:[%s2138_s0 + $0x160] ss:$8 sps:$4 sm:$0xff]   ;;  %v1611_v46 = vld [vmem:[%s2138_s0 + $0x174] ss:$8 sps:$4 sm:$0xff]   ;;  %v1613_v47 = vld [vmem:[%s2138_s0 + $0x70] ss:$8 sps:$4 sm:$0xff]  }
  0x45   :  { %v1614_v48 = vld [vmem:[%s2138_s0 + $0x170] ss:$8 sps:$4 sm:$0xff]   ;;  %v1615_v49 = vld [vmem:[%s2138_s0 + $0x84] ss:$8 sps:$4 sm:$0xff]   ;;  %v1619_v51 = vld [vmem:[%s2138_s0 + $0x80] ss:$8 sps:$4 sm:$0xff]  }
  0x46   :  { %v1617_v50 = vld [vmem:[%s2138_s0 + $0x184] ss:$8 sps:$4 sm:$0xff]   ;;  %v1620_v52 = vld [vmem:[%s2138_s0 + $0x180] ss:$8 sps:$4 sm:$0xff]   ;;  %v1621_v53 = vld [vmem:[%s2138_s0 + $0x94] ss:$8 sps:$4 sm:$0xff]  }
  0x47   :  { %v1623_v54 = vld [vmem:[%s2138_s0 + $0x194] ss:$8 sps:$4 sm:$0xff]   ;;  %v1625_v55 = vld [vmem:[%s2138_s0 + $0x90] ss:$8 sps:$4 sm:$0xff]   ;;  %v1627_v57 = vld [vmem:[%s2138_s0 + $0xa4] ss:$8 sps:$4 sm:$0xff]  }
  0x48   :  { %v1626_v56 = vld [vmem:[%s2138_s0 + $0x190] ss:$8 sps:$4 sm:$0xff]   ;;  %v1629_v58 = vld [vmem:[%s2138_s0 + $0x1a4] ss:$8 sps:$4 sm:$0xff]   ;;  %v1631_v59 = vld [vmem:[%s2138_s0 + $0xa0] ss:$8 sps:$4 sm:$0xff]  }
  0x49   :  { %704 = vmatmul.mubr.bf16.gmra.mrb[4].mxu0 %v1577_v23  ;;  %832 = vmatmul.mubr.bf16.gmra.mrb[4].mxu1 %v1578_v24  ;;  %v1632_v60 = vld [vmem:[%s2138_s0 + $0x1a0] ss:$8 sps:$4 sm:$0xff]   ;;  %v1633_v61 = vld [vmem:[%s2138_s0 + $0xb4] ss:$8 sps:$4 sm:$0xff]   ;;  %v1637_v63 = vld [vmem:[%s2138_s0 + $0xb0] ss:$8 sps:$4 sm:$0xff]  }
  0x4a   :  { %711 = vmatprep.mubr.bf16.mxu0 %v1579_v25  ;;  %839 = vmatprep.mubr.bf16.mxu1 %v1581_v26  ;;  %v1635_v62 = vld [vmem:[%s2138_s0 + $0x1b4] ss:$8 sps:$4 sm:$0xff]   ;;  %v1638_v0 = vld [vmem:[%s2138_s0 + $0x1b0] ss:$8 sps:$4 sm:$0xff]   ;;  %v1639_v1 = vld [vmem:[%s2138_s0 + $0xc4] ss:$8 sps:$4 sm:$0xff]  }
  0x4b   :  { %v1641_v2 = vld [vmem:[%s2138_s0 + $0x1c4] ss:$8 sps:$4 sm:$0xff]   ;;  %v1643_v3 = vld [vmem:[%s2138_s0 + $0xc0] ss:$8 sps:$4 sm:$0xff]   ;;  %v1645_v5 = vld [vmem:[%s2138_s0 + $0xd4] ss:$8 sps:$4 sm:$0xff]  }
  0x4c   :  { %v1644_v4 = vld [vmem:[%s2138_s0 + $0x1c0] ss:$8 sps:$4 sm:$0xff]   ;;  %v1647_v6 = vld [vmem:[%s2138_s0 + $0x1d4] ss:$8 sps:$4 sm:$0xff]   ;;  %v1649_v7 = vld [vmem:[%s2138_s0 + $0xd0] ss:$8 sps:$4 sm:$0xff]  }
  0x4d   :  { %v1650_v8 = vld [vmem:[%s2138_s0 + $0x1d0] ss:$8 sps:$4 sm:$0xff]   ;;  %v1651_v9 = vld [vmem:[%s2138_s0 + $0xe4] ss:$8 sps:$4 sm:$0xff]   ;;  %v1655_v11 = vld [vmem:[%s2138_s0 + $0xe0] ss:$8 sps:$4 sm:$0xff]  }
  0x4e   :  { %v1653_v10 = vld [vmem:[%s2138_s0 + $0x1e4] ss:$8 sps:$4 sm:$0xff]   ;;  %v1656_v12 = vld [vmem:[%s2138_s0 + $0x1e0] ss:$8 sps:$4 sm:$0xff]   ;;  %v1657_v13 = vld [vmem:[%s2138_s0 + $0xf4] ss:$8 sps:$4 sm:$0xff]  }
  0x4f   :  { %v1659_v14 = vld [vmem:[%s2138_s0 + $0x1f4] ss:$8 sps:$4 sm:$0xff]   ;;  %v1661_v15 = vld [vmem:[%s2138_s0 + $0xf0] ss:$8 sps:$4 sm:$0xff]   ;;  %v1991_v17 = vld [vmem:[%s2140_s2] ss:$0 sm:$0xff] }
  0x50   :  { %v1662_v16 = vld [vmem:[%s2138_s0 + $0x1f0] ss:$8 sps:$4 sm:$0xff]   ;;  %v1996_v19 = vld [vmem:[%s2141_s3] ss:$0 sm:$0xff]  ;;  %s1688_s0 = smov [#allocation3]  }
  0x51   :  { %712 = vmatmul.mubr.bf16.gmra.mrb[8].mxu0 %v1583_v27  ;;  %840 = vmatmul.mubr.bf16.gmra.mrb[8].mxu1 %v1584_v28  ;;  %s1422_s2 = sshll.u32 %s1688_s0, 4  ;;  %s1423_s2 = int_to_ptr.vmem [resolvable:$true] %s1422_s2 }
  0x52   :  { %719 = vmatprep.mubr.bf16.mxu0 %v1585_v29  ;;  %847 = vmatprep.mubr.bf16.mxu1 %v1587_v30  ;;  %s1663_s3 = scalar_lea.vmem %s1423_s2, 8192  ;;  %p1668_p1 = scmp.lt.s32.totalorder %s1423_s2, %s1423_s2 }
  0x53   :  { %p1664_p0 = scmp.ne.s32.totalorder %s1423_s2, %s1663_s3  ;;  %p1669_p2 = scmp.lt.s32.totalorder %s1663_s3, %s1663_s3 }
  0x55   :  { %p1670_p3 = por %p1669_p2, %p1668_p1 }
  0x57   :  { %p1671_p4 = pnand %p1670_p3, %p1664_p0 }
  0x59   :  { %720 = vmatmul.mubr.bf16.gmra.mrb[12].mxu0 %v1589_v31  ;;  %848 = vmatmul.mubr.bf16.gmra.mrb[12].mxu1 %v1590_v32 }
  0x5a   :  { %727 = vmatprep.mubr.bf16.mxu0 %v1591_v33  ;;  %855 = vmatprep.mubr.bf16.mxu1 %v1593_v34 }
  0x61   :  { %728 = vmatmul.mubr.bf16.gmra.mrb[16].mxu0 %v1595_v35  ;;  %856 = vmatmul.mubr.bf16.gmra.mrb[16].mxu1 %v1596_v36 }
  0x62   :  { %735 = vmatprep.mubr.bf16.mxu0 %v1597_v37  ;;  %863 = vmatprep.mubr.bf16.mxu1 %v1599_v38 }
  0x69   :  { %736 = vmatmul.mubr.bf16.gmra.mrb[20].mxu0 %v1601_v39  ;;  %864 = vmatmul.mubr.bf16.gmra.mrb[20].mxu1 %v1602_v40 }
  0x6a   :  { %743 = vmatprep.mubr.bf16.mxu0 %v1603_v41  ;;  %871 = vmatprep.mubr.bf16.mxu1 %v1605_v42 }
  0x71   :  { %744 = vmatmul.mubr.bf16.gmra.mrb[24].mxu0 %v1607_v43  ;;  %872 = vmatmul.mubr.bf16.gmra.mrb[24].mxu1 %v1608_v44 }
  0x72   :  { %751 = vmatprep.mubr.bf16.mxu0 %v1609_v45  ;;  %879 = vmatprep.mubr.bf16.mxu1 %v1611_v46 }
  0x79   :  { %752 = vmatmul.mubr.bf16.gmra.mrb[28].mxu0 %v1613_v47  ;;  %880 = vmatmul.mubr.bf16.gmra.mrb[28].mxu1 %v1614_v48 }
  0x7a   :  { %759 = vmatprep.mubr.bf16.mxu0 %v1615_v49  ;;  %887 = vmatprep.mubr.bf16.mxu1 %v1617_v50 }
  0x81   :  { %760 = vmatmul.mubr.bf16.gmra.mrb[32].mxu0 %v1619_v51  ;;  %888 = vmatmul.mubr.bf16.gmra.mrb[32].mxu1 %v1620_v52 }
  0x82   :  { %767 = vmatprep.mubr.bf16.mxu0 %v1621_v53  ;;  %895 = vmatprep.mubr.bf16.mxu1 %v1623_v54 }
  0x89   :  { %768 = vmatmul.mubr.bf16.gmra.mrb[36].mxu0 %v1625_v55  ;;  %896 = vmatmul.mubr.bf16.gmra.mrb[36].mxu1 %v1626_v56 }
  0x8a   :  { %775 = vmatprep.mubr.bf16.mxu0 %v1627_v57  ;;  %903 = vmatprep.mubr.bf16.mxu1 %v1629_v58 }
  0x91   :  { %776 = vmatmul.mubr.bf16.gmra.mrb[40].mxu0 %v1631_v59  ;;  %904 = vmatmul.mubr.bf16.gmra.mrb[40].mxu1 %v1632_v60 }
  0x92   :  { %783 = vmatprep.mubr.bf16.mxu0 %v1633_v61  ;;  %911 = vmatprep.mubr.bf16.mxu1 %v1635_v62 }
  0x99   :  { %784 = vmatmul.mubr.bf16.gmra.mrb[44].mxu0 %v1637_v63  ;;  %912 = vmatmul.mubr.bf16.gmra.mrb[44].mxu1 %v1638_v0 }
  0x9a   :  { %791 = vmatprep.mubr.bf16.mxu0 %v1639_v1  ;;  %919 = vmatprep.mubr.bf16.mxu1 %v1641_v2 }
  0xa1   :  { %792 = vmatmul.mubr.bf16.gmra.mrb[48].mxu0 %v1643_v3  ;;  %920 = vmatmul.mubr.bf16.gmra.mrb[48].mxu1 %v1644_v4 }
  0xa2   :  { %799 = vmatprep.mubr.bf16.mxu0 %v1645_v5  ;;  %927 = vmatprep.mubr.bf16.mxu1 %v1647_v6 }
  0xa9   :  { %800 = vmatmul.mubr.bf16.gmra.mrb[52].mxu0 %v1649_v7  ;;  %928 = vmatmul.mubr.bf16.gmra.mrb[52].mxu1 %v1650_v8 }
  0xaa   :  { %807 = vmatprep.mubr.bf16.mxu0 %v1651_v9  ;;  %935 = vmatprep.mubr.bf16.mxu1 %v1653_v10 }
  0xb1   :  { %808 = vmatmul.mubr.bf16.gmra.mrb[56].mxu0 %v1655_v11  ;;  %936 = vmatmul.mubr.bf16.gmra.mrb[56].mxu1 %v1656_v12 }
  0xb2   :  { %815 = vmatprep.mubr.bf16.mxu0 %v1657_v13  ;;  %943 = vmatprep.mubr.bf16.mxu1 %v1659_v14 }
  0xb9   :  { %816 = vmatmul.mubr.bf16.gmra.mrb[60].mxu0 %v1661_v15  ;;  %944 = vmatmul.mubr.bf16.gmra.mrb[60].mxu1 %v1662_v16 }
 0x114   :  { %v697_v18 = vpop.f32.mrb[0].mxu0  ;;  %v825_v20 = vpop.f32.mrb[0].mxu1 }
 0x115   :  { %v1154_v21 = vmul.f32 %v1991_v17, %v697_v18  ;;  %v1186_v22 = vmul.f32 %v1991_v17, %v825_v20  ;;  %v699_v23 = vpop.f32.mrb[1].mxu0  ;;  %v827_v24 = vpop.f32.mrb[1].mxu1 }
 0x116   :  { %v700_v25 = vpop.f32.mrb[2].mxu0  ;;  %v828_v26 = vpop.f32.mrb[2].mxu1 }
 0x117   :  { %v1225_v27 = vadd.f32 %v1996_v19, %v1154_v21  ;;  %v1257_v28 = vadd.f32 %v1996_v19, %v1186_v22  ;;  %v1155_v29 = vmul.f32 %v1991_v17, %v700_v25  ;;  %v1187_v30 = vmul.f32 %v1991_v17, %v828_v26  ;;  %v702_v31 = vpop.f32.mrb[3].mxu0  ;;  %v830_v32 = vpop.f32.mrb[3].mxu1 }
 0x119   :  { %v1289_v33 = vmax.f32 %v1225_v27, 0.0  ;;  %v1321_v34 = vmax.f32 %v1257_v28, 0.0  ;;  %v1226_v35 = vadd.f32 %v1996_v19, %v1155_v29  ;;  %v1258_v36 = vadd.f32 %v1996_v19, %v1187_v30 }
 0x11b   :  { %1353 = vst [vmem:[#allocation3] sm:$0xff] %v1289_v33  ;;  %1385 = vst [vmem:[#allocation3 + $0x100] sm:$0xff] %v1321_v34  ;;  %v1290_v37 = vmax.f32 %v1226_v35, 0.0  ;;  %v1322_v38 = vmax.f32 %v1258_v36, 0.0 }
 0x11c   :  { %v705_v39 = vpop.f32.mrb[4].mxu0  ;;  %v833_v40 = vpop.f32.mrb[4].mxu1 }
 0x11d   :  { %1354 = vst [vmem:[#allocation3 + $0x8] sm:$0xff] %v1290_v37  ;;  %1386 = vst [vmem:[#allocation3 + $0x108] sm:$0xff] %v1322_v38  ;;  %v1156_v41 = vmul.f32 %v1991_v17, %v705_v39  ;;  %v1188_v42 = vmul.f32 %v1991_v17, %v833_v40  ;;  %v707_v43 = vpop.f32.mrb[5].mxu0  ;;  %v835_v44 = vpop.f32.mrb[5].mxu1 }
 0x11e   :  { %v708_v45 = vpop.f32.mrb[6].mxu0  ;;  %v836_v46 = vpop.f32.mrb[6].mxu1 }
 0x11f   :  { %v1227_v47 = vadd.f32 %v1996_v19, %v1156_v41  ;;  %v1259_v48 = vadd.f32 %v1996_v19, %v1188_v42  ;;  %v1157_v49 = vmul.f32 %v1991_v17, %v708_v45  ;;  %v1189_v50 = vmul.f32 %v1991_v17, %v836_v46  ;;  %v710_v51 = vpop.f32.mrb[7].mxu0  ;;  %v838_v52 = vpop.f32.mrb[7].mxu1 }
 0x121   :  { %v1291_v53 = vmax.f32 %v1227_v47, 0.0  ;;  %v1323_v54 = vmax.f32 %v1259_v48, 0.0  ;;  %v1228_v55 = vadd.f32 %v1996_v19, %v1157_v49  ;;  %v1260_v56 = vadd.f32 %v1996_v19, %v1189_v50 }
 0x123   :  { %1355 = vst [vmem:[#allocation3 + $0x10] sm:$0xff] %v1291_v53  ;;  %1387 = vst [vmem:[#allocation3 + $0x110] sm:$0xff] %v1323_v54  ;;  %v1292_v57 = vmax.f32 %v1228_v55, 0.0  ;;  %v1324_v58 = vmax.f32 %v1260_v56, 0.0 }
 0x124   :  { %v713_v59 = vpop.f32.mrb[8].mxu0  ;;  %v841_v60 = vpop.f32.mrb[8].mxu1 }
 0x125   :  { %1356 = vst [vmem:[#allocation3 + $0x18] sm:$0xff] %v1292_v57  ;;  %1388 = vst [vmem:[#allocation3 + $0x118] sm:$0xff] %v1324_v58  ;;  %v1158_v61 = vmul.f32 %v1991_v17, %v713_v59  ;;  %v1190_v62 = vmul.f32 %v1991_v17, %v841_v60  ;;  %v715_v63 = vpop.f32.mrb[9].mxu0  ;;  %v843_v0 = vpop.f32.mrb[9].mxu1 }
 0x126   :  { %v716_v1 = vpop.f32.mrb[10].mxu0  ;;  %v844_v2 = vpop.f32.mrb[10].mxu1 }
 0x127   :  { %v1229_v3 = vadd.f32 %v1996_v19, %v1158_v61  ;;  %v1261_v4 = vadd.f32 %v1996_v19, %v1190_v62  ;;  %v1159_v5 = vmul.f32 %v1991_v17, %v716_v1  ;;  %v1191_v6 = vmul.f32 %v1991_v17, %v844_v2  ;;  %v718_v7 = vpop.f32.mrb[11].mxu0  ;;  %v846_v8 = vpop.f32.mrb[11].mxu1 }
 0x129   :  { %v1293_v9 = vmax.f32 %v1229_v3, 0.0  ;;  %v1325_v10 = vmax.f32 %v1261_v4, 0.0  ;;  %v1230_v11 = vadd.f32 %v1996_v19, %v1159_v5  ;;  %v1262_v12 = vadd.f32 %v1996_v19, %v1191_v6 }
 0x12b   :  { %1357 = vst [vmem:[#allocation3 + $0x20] sm:$0xff] %v1293_v9  ;;  %1389 = vst [vmem:[#allocation3 + $0x120] sm:$0xff] %v1325_v10  ;;  %v1294_v13 = vmax.f32 %v1230_v11, 0.0  ;;  %v1326_v14 = vmax.f32 %v1262_v12, 0.0 }
 0x12c   :  { %v721_v15 = vpop.f32.mrb[12].mxu0  ;;  %v849_v16 = vpop.f32.mrb[12].mxu1 }
 0x12d   :  { %1358 = vst [vmem:[#allocation3 + $0x28] sm:$0xff] %v1294_v13  ;;  %1390 = vst [vmem:[#allocation3 + $0x128] sm:$0xff] %v1326_v14  ;;  %v1160_v18 = vmul.f32 %v1991_v17, %v721_v15  ;;  %v1192_v20 = vmul.f32 %v1991_v17, %v849_v16  ;;  %v723_v21 = vpop.f32.mrb[13].mxu0  ;;  %v851_v22 = vpop.f32.mrb[13].mxu1 }
 0x12e   :  { %v724_v23 = vpop.f32.mrb[14].mxu0  ;;  %v852_v24 = vpop.f32.mrb[14].mxu1 }
 0x12f   :  { %v1231_v25 = vadd.f32 %v1996_v19, %v1160_v18  ;;  %v1263_v26 = vadd.f32 %v1996_v19, %v1192_v20  ;;  %v1161_v27 = vmul.f32 %v1991_v17, %v724_v23  ;;  %v1193_v28 = vmul.f32 %v1991_v17, %v852_v24  ;;  %v726_v29 = vpop.f32.mrb[15].mxu0  ;;  %v854_v30 = vpop.f32.mrb[15].mxu1 }
 0x131   :  { %v1295_v31 = vmax.f32 %v1231_v25, 0.0  ;;  %v1327_v32 = vmax.f32 %v1263_v26, 0.0  ;;  %v1232_v33 = vadd.f32 %v1996_v19, %v1161_v27  ;;  %v1264_v34 = vadd.f32 %v1996_v19, %v1193_v28 }
 0x133   :  { %1359 = vst [vmem:[#allocation3 + $0x30] sm:$0xff] %v1295_v31  ;;  %1391 = vst [vmem:[#allocation3 + $0x130] sm:$0xff] %v1327_v32  ;;  %v1296_v35 = vmax.f32 %v1232_v33, 0.0  ;;  %v1328_v36 = vmax.f32 %v1264_v34, 0.0 }
 0x134   :  { %v729_v37 = vpop.f32.mrb[16].mxu0  ;;  %v857_v38 = vpop.f32.mrb[16].mxu1 }
 0x135   :  { %1360 = vst [vmem:[#allocation3 + $0x38] sm:$0xff] %v1296_v35  ;;  %1392 = vst [vmem:[#allocation3 + $0x138] sm:$0xff] %v1328_v36  ;;  %v1162_v39 = vmul.f32 %v1991_v17, %v729_v37  ;;  %v1194_v40 = vmul.f32 %v1991_v17, %v857_v38  ;;  %v731_v41 = vpop.f32.mrb[17].mxu0  ;;  %v859_v42 = vpop.f32.mrb[17].mxu1 }
 0x136   :  { %v732_v43 = vpop.f32.mrb[18].mxu0  ;;  %v860_v44 = vpop.f32.mrb[18].mxu1 }
 0x137   :  { %v1233_v45 = vadd.f32 %v1996_v19, %v1162_v39  ;;  %v1265_v46 = vadd.f32 %v1996_v19, %v1194_v40  ;;  %v1163_v47 = vmul.f32 %v1991_v17, %v732_v43  ;;  %v1195_v48 = vmul.f32 %v1991_v17, %v860_v44  ;;  %v734_v49 = vpop.f32.mrb[19].mxu0  ;;  %v862_v50 = vpop.f32.mrb[19].mxu1 }
 0x139   :  { %v1297_v51 = vmax.f32 %v1233_v45, 0.0  ;;  %v1329_v52 = vmax.f32 %v1265_v46, 0.0  ;;  %v1234_v53 = vadd.f32 %v1996_v19, %v1163_v47  ;;  %v1266_v54 = vadd.f32 %v1996_v19, %v1195_v48 }
 0x13b   :  { %1361 = vst [vmem:[#allocation3 + $0x40] sm:$0xff] %v1297_v51  ;;  %1393 = vst [vmem:[#allocation3 + $0x140] sm:$0xff] %v1329_v52  ;;  %v1298_v55 = vmax.f32 %v1234_v53, 0.0  ;;  %v1330_v56 = vmax.f32 %v1266_v54, 0.0 }
 0x13c   :  { %v737_v57 = vpop.f32.mrb[20].mxu0  ;;  %v865_v58 = vpop.f32.mrb[20].mxu1 }
 0x13d   :  { %1362 = vst [vmem:[#allocation3 + $0x48] sm:$0xff] %v1298_v55  ;;  %1394 = vst [vmem:[#allocation3 + $0x148] sm:$0xff] %v1330_v56  ;;  %v1164_v59 = vmul.f32 %v1991_v17, %v737_v57  ;;  %v1196_v60 = vmul.f32 %v1991_v17, %v865_v58  ;;  %v739_v61 = vpop.f32.mrb[21].mxu0  ;;  %v867_v62 = vpop.f32.mrb[21].mxu1 }
 0x13e   :  { %v740_v63 = vpop.f32.mrb[22].mxu0  ;;  %v868_v0 = vpop.f32.mrb[22].mxu1 }
 0x13f   :  { %v1235_v1 = vadd.f32 %v1996_v19, %v1164_v59  ;;  %v1267_v2 = vadd.f32 %v1996_v19, %v1196_v60  ;;  %v1165_v3 = vmul.f32 %v1991_v17, %v740_v63  ;;  %v1197_v4 = vmul.f32 %v1991_v17, %v868_v0  ;;  %v742_v5 = vpop.f32.mrb[23].mxu0  ;;  %v870_v6 = vpop.f32.mrb[23].mxu1 }
 0x141   :  { %v1299_v7 = vmax.f32 %v1235_v1, 0.0  ;;  %v1331_v8 = vmax.f32 %v1267_v2, 0.0  ;;  %v1236_v9 = vadd.f32 %v1996_v19, %v1165_v3  ;;  %v1268_v10 = vadd.f32 %v1996_v19, %v1197_v4 }
 0x143   :  { %1363 = vst [vmem:[#allocation3 + $0x50] sm:$0xff] %v1299_v7  ;;  %1395 = vst [vmem:[#allocation3 + $0x150] sm:$0xff] %v1331_v8  ;;  %v1300_v11 = vmax.f32 %v1236_v9, 0.0  ;;  %v1332_v12 = vmax.f32 %v1268_v10, 0.0 }
 0x144   :  { %v745_v13 = vpop.f32.mrb[24].mxu0  ;;  %v873_v14 = vpop.f32.mrb[24].mxu1 }
 0x145   :  { %1364 = vst [vmem:[#allocation3 + $0x58] sm:$0xff] %v1300_v11  ;;  %1396 = vst [vmem:[#allocation3 + $0x158] sm:$0xff] %v1332_v12  ;;  %v1166_v15 = vmul.f32 %v1991_v17, %v745_v13  ;;  %v1198_v16 = vmul.f32 %v1991_v17, %v873_v14  ;;  %v747_v18 = vpop.f32.mrb[25].mxu0  ;;  %v875_v20 = vpop.f32.mrb[25].mxu1 }
 0x146   :  { %v748_v21 = vpop.f32.mrb[26].mxu0  ;;  %v876_v22 = vpop.f32.mrb[26].mxu1 }
 0x147   :  { %v1237_v23 = vadd.f32 %v1996_v19, %v1166_v15  ;;  %v1269_v24 = vadd.f32 %v1996_v19, %v1198_v16  ;;  %v1167_v25 = vmul.f32 %v1991_v17, %v748_v21  ;;  %v1199_v26 = vmul.f32 %v1991_v17, %v876_v22  ;;  %v750_v27 = vpop.f32.mrb[27].mxu0  ;;  %v878_v28 = vpop.f32.mrb[27].mxu1 }
 0x149   :  { %v1301_v29 = vmax.f32 %v1237_v23, 0.0  ;;  %v1333_v30 = vmax.f32 %v1269_v24, 0.0  ;;  %v1238_v31 = vadd.f32 %v1996_v19, %v1167_v25  ;;  %v1270_v32 = vadd.f32 %v1996_v19, %v1199_v26 }
 0x14b   :  { %1365 = vst [vmem:[#allocation3 + $0x60] sm:$0xff] %v1301_v29  ;;  %1397 = vst [vmem:[#allocation3 + $0x160] sm:$0xff] %v1333_v30  ;;  %v1302_v33 = vmax.f32 %v1238_v31, 0.0  ;;  %v1334_v34 = vmax.f32 %v1270_v32, 0.0 }
 0x14c   :  { %v753_v35 = vpop.f32.mrb[28].mxu0  ;;  %v881_v36 = vpop.f32.mrb[28].mxu1 }
 0x14d   :  { %1366 = vst [vmem:[#allocation3 + $0x68] sm:$0xff] %v1302_v33  ;;  %1398 = vst [vmem:[#allocation3 + $0x168] sm:$0xff] %v1334_v34  ;;  %v1168_v37 = vmul.f32 %v1991_v17, %v753_v35  ;;  %v1200_v38 = vmul.f32 %v1991_v17, %v881_v36  ;;  %v755_v39 = vpop.f32.mrb[29].mxu0  ;;  %v883_v40 = vpop.f32.mrb[29].mxu1 }
 0x14e   :  { %v756_v41 = vpop.f32.mrb[30].mxu0  ;;  %v884_v42 = vpop.f32.mrb[30].mxu1 }
 0x14f   :  { %v1239_v43 = vadd.f32 %v1996_v19, %v1168_v37  ;;  %v1271_v44 = vadd.f32 %v1996_v19, %v1200_v38  ;;  %v1169_v45 = vmul.f32 %v1991_v17, %v756_v41  ;;  %v1201_v46 = vmul.f32 %v1991_v17, %v884_v42  ;;  %v758_v47 = vpop.f32.mrb[31].mxu0  ;;  %v886_v48 = vpop.f32.mrb[31].mxu1 }
 0x151   :  { %v1303_v49 = vmax.f32 %v1239_v43, 0.0  ;;  %v1335_v50 = vmax.f32 %v1271_v44, 0.0  ;;  %v1240_v51 = vadd.f32 %v1996_v19, %v1169_v45  ;;  %v1272_v52 = vadd.f32 %v1996_v19, %v1201_v46 }
 0x153   :  { %1367 = vst [vmem:[#allocation3 + $0x70] sm:$0xff] %v1303_v49  ;;  %1399 = vst [vmem:[#allocation3 + $0x170] sm:$0xff] %v1335_v50  ;;  %v1304_v53 = vmax.f32 %v1240_v51, 0.0  ;;  %v1336_v54 = vmax.f32 %v1272_v52, 0.0 }
 0x154   :  { %v761_v55 = vpop.f32.mrb[32].mxu0  ;;  %v889_v56 = vpop.f32.mrb[32].mxu1 }
 0x155   :  { %1368 = vst [vmem:[#allocation3 + $0x78] sm:$0xff] %v1304_v53  ;;  %1400 = vst [vmem:[#allocation3 + $0x178] sm:$0xff] %v1336_v54  ;;  %v1170_v57 = vmul.f32 %v1991_v17, %v761_v55  ;;  %v1202_v58 = vmul.f32 %v1991_v17, %v889_v56  ;;  %v763_v59 = vpop.f32.mrb[33].mxu0  ;;  %v891_v60 = vpop.f32.mrb[33].mxu1 }
 0x156   :  { %v764_v61 = vpop.f32.mrb[34].mxu0  ;;  %v892_v62 = vpop.f32.mrb[34].mxu1 }
 0x157   :  { %v1241_v63 = vadd.f32 %v1996_v19, %v1170_v57  ;;  %v1273_v0 = vadd.f32 %v1996_v19, %v1202_v58  ;;  %v1171_v1 = vmul.f32 %v1991_v17, %v764_v61  ;;  %v1203_v2 = vmul.f32 %v1991_v17, %v892_v62  ;;  %v766_v3 = vpop.f32.mrb[35].mxu0  ;;  %v894_v4 = vpop.f32.mrb[35].mxu1 }
 0x159   :  { %v1305_v5 = vmax.f32 %v1241_v63, 0.0  ;;  %v1337_v6 = vmax.f32 %v1273_v0, 0.0  ;;  %v1242_v7 = vadd.f32 %v1996_v19, %v1171_v1  ;;  %v1274_v8 = vadd.f32 %v1996_v19, %v1203_v2 }
 0x15b   :  { %1369 = vst [vmem:[#allocation3 + $0x80] sm:$0xff] %v1305_v5  ;;  %1401 = vst [vmem:[#allocation3 + $0x180] sm:$0xff] %v1337_v6  ;;  %v1306_v9 = vmax.f32 %v1242_v7, 0.0  ;;  %v1338_v10 = vmax.f32 %v1274_v8, 0.0 }
 0x15c   :  { %v769_v11 = vpop.f32.mrb[36].mxu0  ;;  %v897_v12 = vpop.f32.mrb[36].mxu1 }
 0x15d   :  { %1370 = vst [vmem:[#allocation3 + $0x88] sm:$0xff] %v1306_v9  ;;  %1402 = vst [vmem:[#allocation3 + $0x188] sm:$0xff] %v1338_v10  ;;  %v1172_v13 = vmul.f32 %v1991_v17, %v769_v11  ;;  %v1204_v14 = vmul.f32 %v1991_v17, %v897_v12  ;;  %v771_v15 = vpop.f32.mrb[37].mxu0  ;;  %v899_v16 = vpop.f32.mrb[37].mxu1 }
 0x15e   :  { %v772_v18 = vpop.f32.mrb[38].mxu0  ;;  %v900_v20 = vpop.f32.mrb[38].mxu1 }
 0x15f   :  { %v1243_v21 = vadd.f32 %v1996_v19, %v1172_v13  ;;  %v1275_v22 = vadd.f32 %v1996_v19, %v1204_v14  ;;  %v1173_v23 = vmul.f32 %v1991_v17, %v772_v18  ;;  %v1205_v24 = vmul.f32 %v1991_v17, %v900_v20  ;;  %v774_v25 = vpop.f32.mrb[39].mxu0  ;;  %v902_v26 = vpop.f32.mrb[39].mxu1 }
 0x161   :  { %v1307_v27 = vmax.f32 %v1243_v21, 0.0  ;;  %v1339_v28 = vmax.f32 %v1275_v22, 0.0  ;;  %v1244_v29 = vadd.f32 %v1996_v19, %v1173_v23  ;;  %v1276_v30 = vadd.f32 %v1996_v19, %v1205_v24 }
 0x163   :  { %1371 = vst [vmem:[#allocation3 + $0x90] sm:$0xff] %v1307_v27  ;;  %1403 = vst [vmem:[#allocation3 + $0x190] sm:$0xff] %v1339_v28  ;;  %v1308_v31 = vmax.f32 %v1244_v29, 0.0  ;;  %v1340_v32 = vmax.f32 %v1276_v30, 0.0 }
 0x164   :  { %v777_v33 = vpop.f32.mrb[40].mxu0  ;;  %v905_v34 = vpop.f32.mrb[40].mxu1 }
 0x165   :  { %1372 = vst [vmem:[#allocation3 + $0x98] sm:$0xff] %v1308_v31  ;;  %1404 = vst [vmem:[#allocation3 + $0x198] sm:$0xff] %v1340_v32  ;;  %v1174_v35 = vmul.f32 %v1991_v17, %v777_v33  ;;  %v1206_v36 = vmul.f32 %v1991_v17, %v905_v34  ;;  %v779_v37 = vpop.f32.mrb[41].mxu0  ;;  %v907_v38 = vpop.f32.mrb[41].mxu1 }
 0x166   :  { %v780_v39 = vpop.f32.mrb[42].mxu0  ;;  %v908_v40 = vpop.f32.mrb[42].mxu1 }
 0x167   :  { %v1245_v41 = vadd.f32 %v1996_v19, %v1174_v35  ;;  %v1277_v42 = vadd.f32 %v1996_v19, %v1206_v36  ;;  %v1175_v43 = vmul.f32 %v1991_v17, %v780_v39  ;;  %v1207_v44 = vmul.f32 %v1991_v17, %v908_v40  ;;  %v782_v45 = vpop.f32.mrb[43].mxu0  ;;  %v910_v46 = vpop.f32.mrb[43].mxu1 }
 0x169   :  { %v1309_v47 = vmax.f32 %v1245_v41, 0.0  ;;  %v1341_v48 = vmax.f32 %v1277_v42, 0.0  ;;  %v1246_v49 = vadd.f32 %v1996_v19, %v1175_v43  ;;  %v1278_v50 = vadd.f32 %v1996_v19, %v1207_v44 }
 0x16b   :  { %1373 = vst [vmem:[#allocation3 + $0xa0] sm:$0xff] %v1309_v47  ;;  %1405 = vst [vmem:[#allocation3 + $0x1a0] sm:$0xff] %v1341_v48  ;;  %v1310_v51 = vmax.f32 %v1246_v49, 0.0  ;;  %v1342_v52 = vmax.f32 %v1278_v50, 0.0 }
 0x16c   :  { %v785_v53 = vpop.f32.mrb[44].mxu0  ;;  %v913_v54 = vpop.f32.mrb[44].mxu1 }
 0x16d   :  { %1374 = vst [vmem:[#allocation3 + $0xa8] sm:$0xff] %v1310_v51  ;;  %1406 = vst [vmem:[#allocation3 + $0x1a8] sm:$0xff] %v1342_v52  ;;  %v1176_v55 = vmul.f32 %v1991_v17, %v785_v53  ;;  %v1208_v56 = vmul.f32 %v1991_v17, %v913_v54  ;;  %v787_v57 = vpop.f32.mrb[45].mxu0  ;;  %v915_v58 = vpop.f32.mrb[45].mxu1 }
 0x16e   :  { %v788_v59 = vpop.f32.mrb[46].mxu0  ;;  %v916_v60 = vpop.f32.mrb[46].mxu1 }
 0x16f   :  { %v1247_v61 = vadd.f32 %v1996_v19, %v1176_v55  ;;  %v1279_v62 = vadd.f32 %v1996_v19, %v1208_v56  ;;  %v1177_v63 = vmul.f32 %v1991_v17, %v788_v59  ;;  %v1209_v0 = vmul.f32 %v1991_v17, %v916_v60  ;;  %v790_v1 = vpop.f32.mrb[47].mxu0  ;;  %v918_v2 = vpop.f32.mrb[47].mxu1 }
 0x171   :  { %v1311_v3 = vmax.f32 %v1247_v61, 0.0  ;;  %v1343_v4 = vmax.f32 %v1279_v62, 0.0  ;;  %v1248_v5 = vadd.f32 %v1996_v19, %v1177_v63  ;;  %v1280_v6 = vadd.f32 %v1996_v19, %v1209_v0 }
 0x173   :  { %1375 = vst [vmem:[#allocation3 + $0xb0] sm:$0xff] %v1311_v3  ;;  %1407 = vst [vmem:[#allocation3 + $0x1b0] sm:$0xff] %v1343_v4  ;;  %v1312_v7 = vmax.f32 %v1248_v5, 0.0  ;;  %v1344_v8 = vmax.f32 %v1280_v6, 0.0 }
 0x174   :  { %v793_v9 = vpop.f32.mrb[48].mxu0  ;;  %v921_v10 = vpop.f32.mrb[48].mxu1 }
 0x175   :  { %1376 = vst [vmem:[#allocation3 + $0xb8] sm:$0xff] %v1312_v7  ;;  %1408 = vst [vmem:[#allocation3 + $0x1b8] sm:$0xff] %v1344_v8  ;;  %v1178_v11 = vmul.f32 %v1991_v17, %v793_v9  ;;  %v1210_v12 = vmul.f32 %v1991_v17, %v921_v10  ;;  %v795_v13 = vpop.f32.mrb[49].mxu0  ;;  %v923_v14 = vpop.f32.mrb[49].mxu1 }
 0x176   :  { %v796_v15 = vpop.f32.mrb[50].mxu0  ;;  %v924_v16 = vpop.f32.mrb[50].mxu1 }
 0x177   :  { %v1249_v18 = vadd.f32 %v1996_v19, %v1178_v11  ;;  %v1281_v20 = vadd.f32 %v1996_v19, %v1210_v12  ;;  %v1179_v21 = vmul.f32 %v1991_v17, %v796_v15  ;;  %v1211_v22 = vmul.f32 %v1991_v17, %v924_v16  ;;  %v798_v23 = vpop.f32.mrb[51].mxu0  ;;  %v926_v24 = vpop.f32.mrb[51].mxu1 }
 0x179   :  { %v1313_v25 = vmax.f32 %v1249_v18, 0.0  ;;  %v1345_v26 = vmax.f32 %v1281_v20, 0.0  ;;  %v1250_v27 = vadd.f32 %v1996_v19, %v1179_v21  ;;  %v1282_v28 = vadd.f32 %v1996_v19, %v1211_v22 }
 0x17b   :  { %1377 = vst [vmem:[#allocation3 + $0xc0] sm:$0xff] %v1313_v25  ;;  %1409 = vst [vmem:[#allocation3 + $0x1c0] sm:$0xff] %v1345_v26  ;;  %v1314_v29 = vmax.f32 %v1250_v27, 0.0  ;;  %v1346_v30 = vmax.f32 %v1282_v28, 0.0 }
 0x17c   :  { %v801_v31 = vpop.f32.mrb[52].mxu0  ;;  %v929_v32 = vpop.f32.mrb[52].mxu1 }
 0x17d   :  { %1378 = vst [vmem:[#allocation3 + $0xc8] sm:$0xff] %v1314_v29  ;;  %1410 = vst [vmem:[#allocation3 + $0x1c8] sm:$0xff] %v1346_v30  ;;  %v1180_v33 = vmul.f32 %v1991_v17, %v801_v31  ;;  %v1212_v34 = vmul.f32 %v1991_v17, %v929_v32  ;;  %v803_v35 = vpop.f32.mrb[53].mxu0  ;;  %v931_v36 = vpop.f32.mrb[53].mxu1 }
 0x17e   :  { %v804_v37 = vpop.f32.mrb[54].mxu0  ;;  %v932_v38 = vpop.f32.mrb[54].mxu1 }
 0x17f   :  { %v1251_v39 = vadd.f32 %v1996_v19, %v1180_v33  ;;  %v1283_v40 = vadd.f32 %v1996_v19, %v1212_v34  ;;  %v1181_v41 = vmul.f32 %v1991_v17, %v804_v37  ;;  %v1213_v42 = vmul.f32 %v1991_v17, %v932_v38  ;;  %v806_v43 = vpop.f32.mrb[55].mxu0  ;;  %v934_v44 = vpop.f32.mrb[55].mxu1 }
 0x181   :  { %v1315_v45 = vmax.f32 %v1251_v39, 0.0  ;;  %v1347_v46 = vmax.f32 %v1283_v40, 0.0  ;;  %v1252_v47 = vadd.f32 %v1996_v19, %v1181_v41  ;;  %v1284_v48 = vadd.f32 %v1996_v19, %v1213_v42 }
 0x183   :  { %1379 = vst [vmem:[#allocation3 + $0xd0] sm:$0xff] %v1315_v45  ;;  %1411 = vst [vmem:[#allocation3 + $0x1d0] sm:$0xff] %v1347_v46  ;;  %v1316_v49 = vmax.f32 %v1252_v47, 0.0  ;;  %v1348_v50 = vmax.f32 %v1284_v48, 0.0 }
 0x184   :  { %v809_v51 = vpop.f32.mrb[56].mxu0  ;;  %v937_v52 = vpop.f32.mrb[56].mxu1 }
 0x185   :  { %1380 = vst [vmem:[#allocation3 + $0xd8] sm:$0xff] %v1316_v49  ;;  %1412 = vst [vmem:[#allocation3 + $0x1d8] sm:$0xff] %v1348_v50  ;;  %v1182_v53 = vmul.f32 %v1991_v17, %v809_v51  ;;  %v1214_v54 = vmul.f32 %v1991_v17, %v937_v52  ;;  %v811_v55 = vpop.f32.mrb[57].mxu0  ;;  %v939_v56 = vpop.f32.mrb[57].mxu1 }
 0x186   :  { %v812_v57 = vpop.f32.mrb[58].mxu0  ;;  %v940_v58 = vpop.f32.mrb[58].mxu1 }
 0x187   :  { %v1253_v59 = vadd.f32 %v1996_v19, %v1182_v53  ;;  %v1285_v60 = vadd.f32 %v1996_v19, %v1214_v54  ;;  %v1183_v61 = vmul.f32 %v1991_v17, %v812_v57  ;;  %v1215_v62 = vmul.f32 %v1991_v17, %v940_v58  ;;  %v814_v63 = vpop.f32.mrb[59].mxu0  ;;  %v942_v0 = vpop.f32.mrb[59].mxu1 }
 0x189   :  { %v1317_v1 = vmax.f32 %v1253_v59, 0.0  ;;  %v1349_v2 = vmax.f32 %v1285_v60, 0.0  ;;  %v1254_v3 = vadd.f32 %v1996_v19, %v1183_v61  ;;  %v1286_v4 = vadd.f32 %v1996_v19, %v1215_v62 }
 0x18b   :  { %1381 = vst [vmem:[#allocation3 + $0xe0] sm:$0xff] %v1317_v1  ;;  %1413 = vst [vmem:[#allocation3 + $0x1e0] sm:$0xff] %v1349_v2  ;;  %v1318_v5 = vmax.f32 %v1254_v3, 0.0  ;;  %v1350_v6 = vmax.f32 %v1286_v4, 0.0 }
 0x18c   :  { %v817_v7 = vpop.f32.mrb[60].mxu0  ;;  %v945_v8 = vpop.f32.mrb[60].mxu1 }
 0x18d   :  { %1382 = vst [vmem:[#allocation3 + $0xe8] sm:$0xff] %v1318_v5  ;;  %1414 = vst [vmem:[#allocation3 + $0x1e8] sm:$0xff] %v1350_v6  ;;  %v1184_v9 = vmul.f32 %v1991_v17, %v817_v7  ;;  %v1216_v10 = vmul.f32 %v1991_v17, %v945_v8  ;;  %v819_v11 = vpop.f32.mrb[61].mxu0  ;;  %v947_v12 = vpop.f32.mrb[61].mxu1 }
 0x18e   :  { %v820_v13 = vpop.f32.mrb[62].mxu0  ;;  %v948_v14 = vpop.f32.mrb[62].mxu1 }
 0x18f   :  { %v1255_v15 = vadd.f32 %v1996_v19, %v1184_v9  ;;  %v1287_v16 = vadd.f32 %v1996_v19, %v1216_v10  ;;  %v1185_v18 = vmul.f32 %v1991_v17, %v820_v13  ;;  %v1217_v20 = vmul.f32 %v1991_v17, %v948_v14  ;;  %v822_v21 = vpop.f32.mrb[63].mxu0  ;;  %v950_v22 = vpop.f32.mrb[63].mxu1 }
 0x191   :  { %v1319_v23 = vmax.f32 %v1255_v15, 0.0  ;;  %v1351_v24 = vmax.f32 %v1287_v16, 0.0  ;;  %v1256_v25 = vadd.f32 %v1996_v19, %v1185_v18  ;;  %v1288_v26 = vadd.f32 %v1996_v19, %v1217_v20 }
 0x193   :  { %1383 = vst [vmem:[#allocation3 + $0xf0] sm:$0xff] %v1319_v23  ;;  %1415 = vst [vmem:[#allocation3 + $0x1f0] sm:$0xff] %v1351_v24  ;;  %v1320_v27 = vmax.f32 %v1256_v25, 0.0  ;;  %v1352_v28 = vmax.f32 %v1288_v26, 0.0 }
 0x195   :  { %1384 = vst [vmem:[#allocation3 + $0xf8] sm:$0xff] %v1320_v27  ;;  %1416 = vst [vmem:[#allocation3 + $0x1f8] sm:$0xff] %v1352_v28 }
 0x196   :  { %1674 = shalt.err (!%p1671_p4)
}
 0x197   :  { %s1675_s20 = scalar_lea.hbm %s2142_s4, 8192 }
 0x198   :  { %p1676_p5 = scmp.ne.s32.totalorder %s2142_s4, %s1675_s20  ;;  %p1679_p6 = scmp.lt.u32.totalorder %s1675_s20, %s2142_s4 }
 0x19a   :  { %p1681_p7 = pnand %p1679_p6, %p1676_p5 }
 0x19c   :  { %1684 = shalt.err (!%p1681_p7)
}
 0x19d   :  { %s1689_s25 = smov 128   ;;  %s1690_s26 = smov 8  }
 0x19e   :  { %1428 = dma.vmem_to_hbm [thread:$0]  %s1423_s2, 8192, %s2142_s4, [#allocation4], %s1689_s25, %s1689_s25, %s1690_s26  }
 0x19f   :  { %1685 = dma.done.wait [#allocation4], 8192  }
 0x1a0   :  { %1686 = vsyncadd [#allocation4], 4294959104 }
 0x1a1   :  { %1432 = vsyncpa [#allocation4], 1 }

</bundles_post_ra>
